<compile_context>
chip_gen: v5e
topology: v5e:2x2
jax: 0.10.0
libtpu: 0.0.40
codegen_flags: <defaults>
</compile_context>

<pallas_src>
import jax
import jax.numpy as jnp
import numpy as np
from jax.experimental import pallas as pl
from jax.experimental.pallas import tpu as pltpu


def _softmax_max_argmax_kernel(predsT_ref, maxprob_ref, argidx_ref):
    # predsT_ref block: (C, rows)  -- classes on sublanes, rows on lanes.
    # maxprob_ref / argidx_ref blocks: (1, rows) -- lane-dense, no transpose.
    x = predsT_ref[...].astype(jnp.float32)                     # (C, rows)
    c = x.shape[0]

    m = jnp.max(x, axis=0, keepdims=True)                       # (1, rows) row max
    # sum of exp fused so the exp intermediate never stays live past the sum
    s = jnp.sum(jnp.exp(x - m), axis=0, keepdims=True)          # (1, rows)
    # max of softmax row == exp(x_max - x_max) / sum == 1 / sum.
    # approx=False = exact reciprocal (approx=True is the EUP estimate).
    inv_s = pl.reciprocal(s, approx=False)

    # argmax along classes, first-match semantics like torch.max(dim=2) /
    # jnp.argmax.  The index table is generated along the sublane axis, so it
    # is a small dense i32 intermediate.
    idx = jax.lax.broadcasted_iota(jnp.int32, x.shape, dimension=0)
    arg = jnp.min(jnp.where(x == m, idx, jnp.int32(c)), axis=0, keepdims=True)

    maxprob_ref[...] = inv_s.astype(maxprob_ref.dtype)
    argidx_ref[...] = arg.astype(argidx_ref.dtype)


def preds_softmax_max_and_index(preds, max_rows=2048):
    """preds: [B, T, C] float -> (preds_max_prob [B, T] f32, preds_index [B, T] i32)."""
    B, T, C = preds.shape
    N = B * T

    # Classes -> sublanes, rows -> lanes (review item 1, option (b)).
    # One small wrapper transpose of the logits; the kernel then reads a
    # perfectly dense layout and never transposes anything.
    predsT = jnp.transpose(preds.reshape(N, C))                  # (C, N)

    if N <= max_rows:
        rows = N                      # single tile, block == full dims, no padding/OOB
    else:
        rows = max_rows               # multiple of 128 -> lane-aligned, unmasked stores

    num_tiles = pl.cdiv(N, rows)
    n_out = num_tiles * rows          # output tiled exactly; only the *input* tail block
                                      # may be clamped by Pallas (garbage lanes sliced off)

    # VMEM budget from the real double-buffered footprint (+ f32 intermediates),
    # with ~2x headroom; stays far under v7x's 64 MiB physical / 32 MiB scoped.
    itemsize = jnp.dtype(preds.dtype).itemsize
    c_pad = -(-C // 8) * 8
    rows_pad = -(-rows // 128) * 128
    in_block = c_pad * rows_pad * itemsize
    f32_block = c_pad * rows_pad * 4
    est = 2 * in_block + 5 * f32_block + 8 * rows_pad * 4
    vmem_limit = int(min(max(2 * est, 8 * 1024 * 1024), 96 * 1024 * 1024))

    maxprob, argidx = pl.pallas_call(
        _softmax_max_argmax_kernel,
        out_shape=(
            jax.ShapeDtypeStruct((1, n_out), jnp.float32),
            jax.ShapeDtypeStruct((1, n_out), jnp.int32),
        ),
        grid=(num_tiles,),
        in_specs=[pl.BlockSpec((C, rows), lambda i: (0, i))],
        out_specs=(
            pl.BlockSpec((1, rows), lambda i: (0, i)),
            pl.BlockSpec((1, rows), lambda i: (0, i)),
        ),
        compiler_params=pltpu.CompilerParams(
            # "parallel" lets megacore chips shard row tiles across TensorCores;
            # pltpu.CORE_PARALLEL would be the explicit v7x alternative but
            # "parallel" is portable across v5e/v6e/v7x.
            dimension_semantics=("parallel",),
            vmem_limit_bytes=vmem_limit,
        ),
    )(predsT)  # kernel upcasts to f32 internally -- no wrapper cast

    maxprob = maxprob[0, :N].reshape(B, T)
    argidx = argidx[0, :N].reshape(B, T)
    return maxprob, argidx


def validate_step(preds, gt_index):
    """Numeric portion of validate.forward for one batch.

    preds:    [B, T, C] model logits
    gt_index: [B, T]    ground-truth class indices (stand-in for encoded labels)

    Returns (preds_max_prob [B,T], preds_index [B,T], n_correct scalar).
    # TODO(synk): converter.decode string decoding, '[EOS]' truncation and the
    # alphanumeric regex filtering are host-side string ops with no Pallas
    # equivalent; n_correct here is exact index-sequence match instead.
    """
    preds_max_prob, preds_index = preds_softmax_max_and_index(preds)
    n_correct = jnp.sum(jnp.all(preds_index == gt_index, axis=-1).astype(jnp.int32))
    return preds_max_prob, preds_index, n_correct


if __name__ == "__main__":
    key = jax.random.PRNGKey(0)
    B, T, C = 2, 8, 38  # batch, max decode length, charset size (incl. specials)
    k1, k2 = jax.random.split(key)
    preds = jax.random.normal(k1, (B, T, C), dtype=jnp.float32)
    gt_index = jax.random.randint(k2, (B, T), 0, C, dtype=jnp.int32)

    preds_max_prob, preds_index, n_correct = jax.block_until_ready(
        validate_step(preds, gt_index)
    )

    # Reference check against plain JAX (torch semantics: softmax dim=2, max dim=2)
    ref_prob = jnp.max(jax.nn.softmax(preds, axis=2), axis=2)
    ref_idx = jnp.argmax(preds, axis=2).astype(jnp.int32)
    assert np.allclose(np.asarray(preds_max_prob), np.asarray(ref_prob), atol=1e-5)
    assert np.array_equal(np.asarray(preds_index), np.asarray(ref_idx))

    print("KERNEL_OK")
</pallas_src>

<mosaic_0001>
module attributes {stable_mosaic.version = 11 : i64} {
  func.func @_softmax_max_argmax_kernel(%arg0: i32, %arg1: memref<38x16xf32, #tpu.memory_space<vmem>>, %arg2: memref<1x16xf32, #tpu.memory_space<vmem>>, %arg3: memref<1x16xi32, #tpu.memory_space<vmem>>) attributes {dimension_semantics = [#tpu.dimension_semantics<parallel>], iteration_bounds = array<i64: 1>, scalar_prefetch = 0 : i64, scratch_operands = 0 : i64, tpu.core_type = #tpu.core_type<tc>, window_params = [{transform_indices = @transform_0, window_bounds = array<i64: 38, 16>}, {transform_indices = @transform_1, window_bounds = array<i64: 1, 16>}, {transform_indices = @transform_2, window_bounds = array<i64: 1, 16>}]} {
    %c0 = arith.constant 0 : index
    %c0_0 = arith.constant 0 : index
    %0 = vector.load %arg1[%c0, %c0_0] : memref<38x16xf32, #tpu.memory_space<vmem>>, vector<38x16xf32>
    %cst = arith.constant dense<0xFF800000> : vector<16xf32>
    %1 = vector.multi_reduction <maximumf>, %0, %cst [0] : vector<38x16xf32> to vector<16xf32>
    %2 = vector.shape_cast %1 : vector<16xf32> to vector<1x16xf32>
    %3 = vector.broadcast %2 : vector<1x16xf32> to vector<38x16xf32>
    %4 = arith.subf %0, %3 : vector<38x16xf32>
    %5 = math.exp %4 : vector<38x16xf32>
    %cst_1 = arith.constant dense<0.000000e+00> : vector<16xf32>
    %6 = vector.multi_reduction <add>, %5, %cst_1 [0] : vector<38x16xf32> to vector<16xf32>
    %7 = vector.shape_cast %6 : vector<16xf32> to vector<1x16xf32>
    %8 = tpu.reciprocal %7 : vector<1x16xf32> -> vector<1x16xf32>
    %9 = tpu.iota {dimensions = array<i32: 0>} : vector<38x16xi32>
    %10 = vector.broadcast %2 : vector<1x16xf32> to vector<38x16xf32>
    %11 = arith.cmpf oeq, %0, %10 : vector<38x16xf32>
    %c38_i32 = arith.constant 38 : i32
    %12 = vector.broadcast %c38_i32 : i32 to vector<38x16xi32>
    %13 = arith.select %11, %9, %12 : vector<38x16xi1>, vector<38x16xi32>
    %cst_2 = arith.constant dense<2147483647> : vector<16xi32>
    %14 = vector.multi_reduction <minsi>, %13, %cst_2 [0] : vector<38x16xi32> to vector<16xi32>
    %15 = vector.shape_cast %14 : vector<16xi32> to vector<1x16xi32>
    %c0_3 = arith.constant 0 : index
    %c0_4 = arith.constant 0 : index
    %16 = vector.load %arg2[%c0_3, %c0_4] : memref<1x16xf32, #tpu.memory_space<vmem>>, vector<1x16xf32>
    tpu.vector_store %arg2[%c0_3, %c0_4], %8 {strides = array<i32>} : memref<1x16xf32, #tpu.memory_space<vmem>>, vector<1x16xf32>,
    %c0_5 = arith.constant 0 : index
    %c0_6 = arith.constant 0 : index
    %17 = vector.load %arg3[%c0_5, %c0_6] : memref<1x16xi32, #tpu.memory_space<vmem>>, vector<1x16xi32>
    tpu.vector_store %arg3[%c0_5, %c0_6], %15 {strides = array<i32>} : memref<1x16xi32, #tpu.memory_space<vmem>>, vector<1x16xi32>,
    return
  }
  func.func @transform_0(%arg0: i32) -> (i32, i32) {
    %c0_i32 = arith.constant 0 : i32
    %c0_i32_0 = arith.constant 0 : i32
    return %c0_i32, %arg0 : i32, i32
  }
  func.func @transform_1(%arg0: i32) -> (i32, i32) {
    %c0_i32 = arith.constant 0 : i32
    %c0_i32_0 = arith.constant 0 : i32
    return %c0_i32, %arg0 : i32, i32
  }
  func.func @transform_2(%arg0: i32) -> (i32, i32) {
    %c0_i32 = arith.constant 0 : i32
    %c0_i32_0 = arith.constant 0 : i32
    return %c0_i32, %arg0 : i32, i32
  }
}

</mosaic_0001>

<bundles_post_ra>
// kernel: tpu_custom_call.1
= control target key start
LH: loop header
LB: loop body
LE: loop exit
PB: predicated region body
PF: predicated region fallthrough
CT: control target
= control target key end

     0   :  { %8 = vsyncpa [#allocation3], 0  ;;  %vm17_vm0 = vcmask 130048   ;;  %vm22_vm1 = vcmask 128000   ;;  %s272_s0 = inlined_call_operand.vmem [shape: f32[38,16], index: 0, kind: input, shape index: {}]   ;;  %s273_s1 = inlined_call_operand.hbm [shape: f32[1,16], index: 1, kind: output, shape index: {0}]   ;;  %s274_s2 = inlined_call_operand.hbm [shape: s32[1,16], index: 2, kind: output, shape index: {1}]  }
   0x1   :  { %v12_v0 = vld [vmem:[%s272_s0] sm:$0xff]  ;;  %v13_v1 = vld [vmem:[%s272_s0 + $0x8] sm:$0xff]  ;;  %v14_v2 = vld [vmem:[%s272_s0 + $0x10] sm:$0xff] }
   0x2   :  { %v15_v3 = vld [vmem:[%s272_s0 + $0x18] sm:$0xff]  ;;  %v16_v4 = vld [vmem:[%s272_s0 + $0x20] sm:$0x3f]  ;;  %v18_v5 = vsel %vm17_vm0, %v12_v0, -inf  ;;  %v20_v6 = vsel %vm17_vm0, %v14_v2, -inf  ;;  %v19_v7 = vsel %vm17_vm0, %v13_v1, -inf }
   0x3   :  { %v21_v8 = vsel %vm17_vm0, %v15_v3, -inf  ;;  %v23_v9 = vsel %vm22_vm1, %v16_v4, -inf }
   0x4   :  { %9 = vsyncpa [#allocation5], 0  ;;  %v24_v10 = vmax.f32 %v18_v5, %v23_v9  ;;  %v26_v11 = vmax.f32 %v20_v6, %v21_v8  ;;  %v78_v17 = vlaneseq  ;;  %s217_s0 = smov [#allocation4]   ;;  %s137_s22 = sshll.u32 %s274_s2, 4  ;;  %vm116_vm13 = vcmask 122880   ;;  %s138_s22 = int_to_ptr.hbm [resolvable:$true] %s137_s22 }
   0x5   :  { %s135_s19 = sshll.u32 %s217_s0, 4  ;;  %s218_s2 = smov [#allocation2]   ;;  %s136_s19 = int_to_ptr.vmem [resolvable:$true] %s135_s19 }
   0x6   :  { %v25_v12 = vmax.f32 %v24_v10, %v19_v7  ;;  %v79_v19 = vshrl.u32 %v78_v17, 7  ;;  %s124_s23 = sshll.u32 %s218_s2, 4  ;;  %s126_s26 = sshll.u32 %s273_s1, 4  ;;  %s125_s23 = int_to_ptr.vmem [resolvable:$true] %s124_s23  ;;  %s127_s26 = int_to_ptr.hbm [resolvable:$true] %s126_s26 }
   0x8   :  { %v27_v13 = vmax.f32 %v25_v12, %v26_v11  ;;  %v80_v22 = vadd.s32 8, %v79_v19  ;;  %v81_v23 = vadd.s32 16, %v79_v19  ;;  %v82_v24 = vadd.s32 24, %v79_v19 }
   0x9   :  { %v83_v25 = vadd.s32 32, %v79_v19 }
   0xa   :  { %v28_v14 = vrot.slane %v27_v13, 4 }
   0xc   :  { %v29_v15 = vmax.f32 %v27_v13, %v28_v14 }
   0xe   :  { %v30_v16 = vrot.slane %v29_v15, 2 }
  0x10   :  { %v31_v18 = vmax.f32 %v29_v15, %v30_v16 }
  0x12   :  { %v32_v20 = vrot.slane %v31_v18, 1 }
  0x14   :  { %v33_v21 = vmax.f32 %v31_v18, %v32_v20 }
  0x16   :  { %v34_v26 = vsub.f32 %v12_v0, %v33_v21  ;;  %v35_v27 = vsub.f32 %v13_v1, %v33_v21  ;;  %v36_v28 = vsub.f32 %v14_v2, %v33_v21  ;;  %v37_v29 = vsub.f32 %v15_v3, %v33_v21 }
  0x17   :  { %v38_v30 = vsub.f32 %v16_v4, %v33_v21  ;;  %vm84_vm2 = vcmp.eq.f32.partialorder %v12_v0, %v33_v21  ;;  %vm85_vm3 = vcmp.eq.f32.partialorder %v13_v1, %v33_v21  ;;  %vm86_vm4 = vcmp.eq.f32.partialorder %v14_v2, %v33_v21 }
  0x18   :  { %v39_v31 = vmul.f32 1.442695, %v34_v26  ;;  %v41_v32 = vmul.f32 1.442695, %v35_v27  ;;  %v43_v33 = vmul.f32 1.442695, %v36_v28  ;;  %vm87_vm5 = vcmp.eq.f32.partialorder %v15_v3, %v33_v21 }
  0x19   :  { %v45_v34 = vmul.f32 1.442695, %v37_v29  ;;  %v47_v35 = vmul.f32 1.442695, %v38_v30  ;;  %vm88_vm6 = vcmp.eq.f32.partialorder %v16_v4, %v33_v21  ;;  %v89_v36 = vsel %vm84_vm2, %v79_v19, 38 }
  0x1a   :  { %153 = vpow2.f32 %v39_v31  ;;  %v90_v37 = vsel %vm85_vm3, %v80_v22, 38  ;;  %v91_v38 = vsel %vm86_vm4, %v81_v23, 38  ;;  %v92_v39 = vsel %vm87_vm5, %v82_v24, 38 }
  0x1b   :  { %155 = vpow2.f32 %v41_v32  ;;  %v93_v40 = vsel %vm88_vm6, %v83_v25, 38  ;;  %v94_v41 = vsel %vm17_vm0, %v89_v36, 2147483647  ;;  %v95_v42 = vsel %vm17_vm0, %v90_v37, 2147483647 }
  0x1c   :  { %157 = vpow2.f32 %v43_v33  ;;  %v96_v43 = vsel %vm17_vm0, %v91_v38, 2147483647  ;;  %v97_v44 = vsel %vm17_vm0, %v92_v39, 2147483647  ;;  %v98_v45 = vsel %vm22_vm1, %v93_v40, 2147483647 }
  0x1d   :  { %159 = vpow2.f32 %v45_v34  ;;  %vm99_vm7 = vcmp.lt.s32.totalorder %v94_v41, %v98_v45  ;;  %vm103_vm8 = vcmp.lt.s32.totalorder %v96_v43, %v97_v44 }
  0x1e   :  { %161 = vpow2.f32 %v47_v35  ;;  %v100_v46 = vsel %vm99_vm7, %v94_v41, %v98_v45  ;;  %v104_v47 = vsel %vm103_vm8, %v96_v43, %v97_v44 }
  0x1f   :  { %vm101_vm9 = vcmp.lt.s32.totalorder %v100_v46, %v95_v42 }
  0x20   :  { %v154_v48 = vpop.eup %153  ;;  %v102_v49 = vsel %vm101_vm9, %v100_v46, %v95_v42 }
  0x21   :  { %v156_v50 = vpop.eup %155  ;;  %v49_v51 = vsel %vm17_vm0, %v154_v48, 0.0  ;;  %vm105_vm10 = vcmp.lt.s32.totalorder %v102_v49, %v104_v47 }
  0x22   :  { %v158_v52 = vpop.eup %157  ;;  %v50_v53 = vsel %vm17_vm0, %v156_v50, 0.0  ;;  %v106_v54 = vsel %vm105_vm10, %v102_v49, %v104_v47 }
  0x23   :  { %v160_v55 = vpop.eup %159  ;;  %v51_v56 = vadd.f32 %v50_v53, %v49_v51  ;;  %v52_v57 = vsel %vm17_vm0, %v158_v52, 0.0  ;;  %v107_v58 = vrot.slane %v106_v54, 4 }
  0x24   :  { %v162_v59 = vpop.eup %161  ;;  %v54_v60 = vsel %vm17_vm0, %v160_v55, 0.0 }
  0x25   :  { %v53_v61 = vadd.f32 %v52_v57, %v51_v56  ;;  %vm108_vm11 = vcmp.lt.s32.totalorder %v106_v54, %v107_v58  ;;  %v56_v62 = vsel %vm22_vm1, %v162_v59, 0.0 }
  0x26   :  { %v109_v63 = vsel %vm108_vm11, %v106_v54, %v107_v58 }
  0x27   :  { %v55_v0 = vadd.f32 %v54_v60, %v53_v61  ;;  %v110_v1 = vrot.slane %v109_v63, 2 }
  0x29   :  { %v57_v2 = vadd.f32 %v56_v62, %v55_v0  ;;  %vm111_vm12 = vcmp.lt.s32.totalorder %v109_v63, %v110_v1 }
  0x2a   :  { %v112_v3 = vsel %vm111_vm12, %v109_v63, %v110_v1 }
  0x2b   :  { %v58_v4 = vrot.slane %v57_v2, 4  ;;  %v113_v5 = vrot.slane %v112_v3, 1 }
  0x2d   :  { %v59_v6 = vadd.f32 %v58_v4, %v57_v2  ;;  %vm114_vm14 = vcmp.lt.s32.totalorder %v112_v3, %v113_v5 }
  0x2e   :  { %v115_v7 = vsel %vm114_vm14, %v112_v3, %v113_v5 }
  0x2f   :  { %v60_v8 = vrot.slane %v59_v6, 2  ;;  %118 = vst.msk [vmem:[#allocation4] sm:$0x1] %vm116_vm13, %v115_v7 }
  0x30   :  { %140 = dma.vmem_to_hbm [thread:$0]  %s136_s19, 16, %s138_s22, [#allocation5]  }
  0x31   :  { %v61_v9 = vadd.f32 %v60_v8, %v59_v6 }
  0x33   :  { %v62_v10 = vrot.slane %v61_v9, 1 }
  0x35   :  { %v63_v11 = vadd.f32 %v62_v10, %v61_v9 }
  0x37   :  { %163 = vrcp.f32 %v63_v11  ;;  %v75_v14 = vand.u32 2147483648, %v63_v11  ;;  %vm69_vm15 = vweird.f32 %v63_v11  ;;  %v73_v16 = vand.u32 2147483647, %v63_v11 }
  0x39   :  { %v76_v18 = vor.u32 1.1754944e-38, %v75_v14  ;;  %vm74_vm2 = vcmp.eq.f32.partialorder %v73_v16, 8.507059e+37 }
  0x3d   :  { %v164_v12 = vpop.eup %163 }
  0x3e   :  { %v65_v13 = vmul.f32 %v164_v12, %v63_v11  ;;  %vm70_vm0 = vweird.f32 %v164_v12 }
  0x3f   :  { %vm71_vm1 = vmor %vm69_vm15, %vm70_vm0 }
  0x40   :  { %v66_v15 = vsub.f32 1.0, %v65_v13 }
  0x42   :  { %v67_v17 = vmul.f32 %v164_v12, %v66_v15 }
  0x44   :  { %v68_v19 = vadd.f32 %v164_v12, %v67_v17 }
  0x46   :  { %v72_v20 = vsel %vm71_vm1, %v164_v12, %v68_v19 }
  0x47   :  { %v77_v21 = vsel %vm74_vm2, %v76_v18, %v72_v20 }
  0x48   :  { %117 = vst.msk [vmem:[#allocation2] sm:$0x1] %vm116_vm13, %v77_v21 }
  0x49   :  { %129 = dma.vmem_to_hbm [thread:$0]  %s125_s23, 16, %s127_s26, [#allocation3]  }
  0x4a   :  { %213 = dma.done.wait [#allocation3], 16  }
  0x4b   :  { %214 = vsyncadd [#allocation3], 4294967280 }
  0x4c   :  { %215 = dma.done.wait [#allocation5], 16  }
  0x4d   :  { %216 = vsyncadd [#allocation5], 4294967280 }
  0x4e   :  { %149 = vsyncpa [#allocation3], 1 }
  0x4f   :  { %150 = vsyncpa [#allocation5], 1 }

</bundles_post_ra>
